<compile_context>
chip_gen: v6e
topology: v6e:2x2x1
jax: 0.10.0
libtpu: 0.0.40
codegen_flags: <defaults>
</compile_context>

<pallas_src>
import functools

import jax
import jax.numpy as jnp
from jax.experimental import pallas as pl
from jax.experimental.pallas import tpu as pltpu


def _predictor_bs_kernel(x_ref,
                         w1_ref, b1_ref,
                         w2_ref, b2_ref,
                         w3_ref, b3_ref,
                         w4_ref, b4_ref,
                         o_ref):
    """All bands fused into one 2-D matmul chain; f32 accumulate throughout."""
    wdt = w1_ref.dtype  # packed weight dtype (f32 or bf16)

    h = jnp.dot(x_ref[...].astype(wdt), w1_ref[...],
                preferred_element_type=jnp.float32) + b1_ref[...]
    h = jnp.maximum(h, 0.0)                               # (TB, n*L0)

    h = jnp.dot(h.astype(wdt), w2_ref[...],
                preferred_element_type=jnp.float32) + b2_ref[...]
    h = jnp.maximum(h, 0.0)                               # (TB, n*L1)

    h = jnp.dot(h.astype(wdt), w3_ref[...],
                preferred_element_type=jnp.float32) + b3_ref[...]
    h = jnp.maximum(h, 0.0)                               # (TB, n*L2)

    h = jnp.dot(h.astype(wdt), w4_ref[...],
                preferred_element_type=jnp.float32) + b4_ref[...]
    o_ref[...] = h.astype(o_ref.dtype)                    # (TB, pad128(n*P))


def _round_up(x, m):
    return ((x + m - 1) // m) * m


def _block_diag(w):
    """(n, din, dout) stacked per-band weights -> (n*din, n*dout) block-diag."""
    n, din, dout = w.shape
    out = jnp.zeros((n * din, n * dout), w.dtype)
    for i in range(n):
        out = out.at[i * din:(i + 1) * din, i * dout:(i + 1) * dout].set(w[i])
    return out


def pack_params(params, num_bands, *, weight_dtype=jnp.float32):
    """One-time packing of per-band weights into lane-dense kernel operands.

    Call once at init; pass the result to predictor_bs_forward on every step.
    """
    n = num_bands
    w1, b1 = params["w1"], params["b1"]   # (n, H,  L0), (n, 1, L0)
    w2, b2 = params["w2"], params["b2"]   # (n, L0, L1), (n, 1, L1)
    w3, b3 = params["w3"], params["b3"]   # (n, L1, L2), (n, 1, L2)
    w4, b4 = params["w4"], params["b4"]   # (n, L2, P ), (n, 1, P )
    H, L0 = w1.shape[1], w1.shape[2]
    L1, L2, P = w2.shape[2], w3.shape[2], w4.shape[2]

    # Layer 1: same x feeds every band -> lane-concat across bands.
    w1p = jnp.transpose(w1, (1, 0, 2)).reshape(H, n * L0)   # cols: band*L0 + j
    b1p = b1.reshape(1, n * L0)

    # Layers 2-3: block-diagonal keeps bands independent (ReLU is elementwise).
    w2p, b2p = _block_diag(w2), b2.reshape(1, n * L1)
    w3p, b3p = _block_diag(w3), b3.reshape(1, n * L2)

    # Layer 4: block-diag, then permute columns to predict-major order
    # (new col = p*n + band) so the kernel output is already (B, P, n)-ordered.
    w4p, b4p = _block_diag(w4), b4.reshape(1, n * P)
    perm = (jnp.arange(P)[:, None] + P * jnp.arange(n)[None, :]).reshape(-1)
    w4p = w4p[:, perm]
    b4p = b4p[:, perm]

    # Pad the final lane dim to a multiple of 128 -> unmasked vector stores.
    NP = n * P
    NP_pad = _round_up(NP, 128)
    if NP_pad != NP:
        w4p = jnp.pad(w4p, ((0, 0), (0, NP_pad - NP)))
        b4p = jnp.pad(b4p, ((0, 0), (0, NP_pad - NP)))

    packed = {
        "w1p": w1p.astype(weight_dtype), "b1p": b1p.astype(jnp.float32),
        "w2p": w2p.astype(weight_dtype), "b2p": b2p.astype(jnp.float32),
        "w3p": w3p.astype(weight_dtype), "b3p": b3p.astype(jnp.float32),
        "w4p": w4p.astype(weight_dtype), "b4p": b4p.astype(jnp.float32),
    }
    return packed


@functools.partial(jax.jit, static_argnames=("num_bands", "num_predict"))
def predictor_bs_forward(x, packed, *, num_bands, num_predict):
    """x: (B, hidden_dim); packed: output of pack_params().

    Returns (B, num_predict, num_bands), matching the PyTorch module.
    """
    B, H = x.shape
    n, P = num_bands, num_predict
    NP = n * P

    w1p, b1p = packed["w1p"], packed["b1p"]
    w2p, b2p = packed["w2p"], packed["b2p"]
    w3p, b3p = packed["w3p"], packed["b3p"]
    w4p, b4p = packed["w4p"], packed["b4p"]
    NP_pad = w4p.shape[1]

    # Batch tiling: one block at small B; sharded across TCs at large B.
    TB = min(256, _round_up(B, 8))
    B_pad = _round_up(B, TB)
    if B_pad != B:
        x = jnp.pad(x, ((0, B_pad - B), (0, 0)))
    grid = (B_pad // TB,)

    itemsize = jnp.dtype(w1p.dtype).itemsize
    flops = 2 * B_pad * (H * w1p.shape[1]
                         + w2p.shape[0] * w2p.shape[1]
                         + w3p.shape[0] * w3p.shape[1]
                         + w4p.shape[0] * w4p.shape[1])
    bytes_accessed = (
        4 * (x.size + b1p.size + b2p.size + b3p.size + b4p.size + B_pad * NP_pad)
        + itemsize * (w1p.size + w2p.size + w3p.size + w4p.size))
    cost = pl.CostEstimate(flops=flops, transcendentals=0,
                           bytes_accessed=bytes_accessed)

    full = lambda w: pl.BlockSpec(w.shape, lambda i: (0, 0))
    out = pl.pallas_call(
        _predictor_bs_kernel,
        out_shape=jax.ShapeDtypeStruct((B_pad, NP_pad), jnp.float32),
        grid_spec=pltpu.PrefetchScalarGridSpec(
            num_scalar_prefetch=0,
            grid=grid,
            in_specs=[
                pl.BlockSpec((TB, H), lambda i: (i, 0)),
                full(w1p), full(b1p),
                full(w2p), full(b2p),
                full(w3p), full(b3p),
                full(w4p), full(b4p),
            ],
            out_specs=pl.BlockSpec((TB, NP_pad), lambda i: (i, 0)),
        ),
        compiler_params=pltpu.CompilerParams(
            dimension_semantics=("parallel",),
            vmem_limit_bytes=8 << 20),
        cost_estimate=cost,
    )(x, w1p, b1p, w2p, b2p, w3p, b3p, w4p, b4p)

    # Columns are already predict-major: (B, P*n) -> (B, P, n). No transpose.
    return out[:B, :NP].reshape(B, P, n).astype(x.dtype)


def init_params(key, num_bands, hidden_dim, num_predict, Lvp, dtype=jnp.float32):
    """Deterministic per-band params, stacked along a leading band axis."""
    dims = [hidden_dim, Lvp[0], Lvp[1], Lvp[2], num_predict]
    params = {}
    for layer in range(4):
        fan_in, fan_out = dims[layer], dims[layer + 1]
        key, kw, kb = jax.random.split(key, 3)
        bound = 1.0 / (fan_in ** 0.5)   # torch.nn.Linear default init range
        params[f"w{layer + 1}"] = jax.random.uniform(
            kw, (num_bands, fan_in, fan_out), dtype, minval=-bound, maxval=bound)
        params[f"b{layer + 1}"] = jax.random.uniform(
            kb, (num_bands, 1, fan_out), dtype, minval=-bound, maxval=bound)
    return params


def predictor_bs_ref(x, params, num_bands):
    """Pure-JAX reference mirroring the PyTorch forward."""
    outs = []
    for i in range(num_bands):
        h = x
        for layer in range(1, 5):
            w = params[f"w{layer}"][i]
            b = params[f"b{layer}"][i]
            h = h @ w + b
            if layer < 4:
                h = jnp.maximum(h, 0.0)
        outs.append(h[:, :, None])
    return jnp.concatenate(outs, axis=2)


if __name__ == "__main__":
    num_bands = 3
    hidden_dim = 32
    num_predict = 16
    Lvp = (64, 48, 40)
    B = 8

    key = jax.random.PRNGKey(0)
    key, kx = jax.random.split(key)
    x = jax.random.normal(kx, (B, hidden_dim), dtype=jnp.float32)
    params = init_params(key, num_bands, hidden_dim, num_predict, Lvp)
    ref = predictor_bs_ref(x, params, num_bands)

    # f32 weights: tight correctness check.
    packed_f32 = pack_params(params, num_bands, weight_dtype=jnp.float32)
    packed_f32 = jax.tree_util.tree_map(jax.block_until_ready, packed_f32)
    out = predictor_bs_forward(x, packed_f32,
                               num_bands=num_bands, num_predict=num_predict)
    out = jax.block_until_ready(out)
    assert out.shape == (B, num_predict, num_bands), out.shape
    assert jnp.allclose(out, ref, atol=1e-5, rtol=1e-5)

    # bf16 packed weights (recommended perf config on v5e/v6e/v7x): looser check.
    packed_bf16 = pack_params(params, num_bands, weight_dtype=jnp.bfloat16)
    out_bf16 = predictor_bs_forward(x, packed_bf16,
                                    num_bands=num_bands, num_predict=num_predict)
    out_bf16 = jax.block_until_ready(out_bf16)
    assert out_bf16.shape == (B, num_predict, num_bands), out_bf16.shape
    assert jnp.allclose(out_bf16, ref, atol=5e-2, rtol=5e-2)

    print("KERNEL_OK")
</pallas_src>

<mosaic_0001>
module attributes {stable_mosaic.version = 11 : i64} {
  func.func @_predictor_bs_kernel(%arg0: i32, %arg1: memref<8x32xf32, #tpu.memory_space<vmem>>, %arg2: memref<32x192xf32, #tpu.memory_space<vmem>>, %arg3: memref<1x192xf32, #tpu.memory_space<vmem>>, %arg4: memref<192x144xf32, #tpu.memory_space<vmem>>, %arg5: memref<1x144xf32, #tpu.memory_space<vmem>>, %arg6: memref<144x120xf32, #tpu.memory_space<vmem>>, %arg7: memref<1x120xf32, #tpu.memory_space<vmem>>, %arg8: memref<120x128xf32, #tpu.memory_space<vmem>>, %arg9: memref<1x128xf32, #tpu.memory_space<vmem>>, %arg10: memref<8x128xf32, #tpu.memory_space<vmem>>) attributes {dimension_semantics = [#tpu.dimension_semantics<parallel>], iteration_bounds = array<i64: 1>, scalar_prefetch = 0 : i64, scratch_operands = 0 : i64, tpu.core_type = #tpu.core_type<tc>, window_params = [{transform_indices = @transform_0, window_bounds = array<i64: 8, 32>}, {pipeline_mode = #tpu.pipeline_mode<synchronous>, transform_indices = @transform_1, window_bounds = array<i64: 32, 192>}, {pipeline_mode = #tpu.pipeline_mode<synchronous>, transform_indices = @transform_2, window_bounds = array<i64: 1, 192>}, {pipeline_mode = #tpu.pipeline_mode<synchronous>, transform_indices = @transform_3, window_bounds = array<i64: 192, 144>}, {pipeline_mode = #tpu.pipeline_mode<synchronous>, transform_indices = @transform_4, window_bounds = array<i64: 1, 144>}, {pipeline_mode = #tpu.pipeline_mode<synchronous>, transform_indices = @transform_5, window_bounds = array<i64: 144, 120>}, {pipeline_mode = #tpu.pipeline_mode<synchronous>, transform_indices = @transform_6, window_bounds = array<i64: 1, 120>}, {pipeline_mode = #tpu.pipeline_mode<synchronous>, transform_indices = @transform_7, window_bounds = array<i64: 120, 128>}, {pipeline_mode = #tpu.pipeline_mode<synchronous>, transform_indices = @transform_8, window_bounds = array<i64: 1, 128>}, {transform_indices = @transform_9, window_bounds = array<i64: 8, 128>}]} {
    %c0 = arith.constant 0 : index
    %c0_0 = arith.constant 0 : index
    %0 = vector.load %arg1[%c0, %c0_0] : memref<8x32xf32, #tpu.memory_space<vmem>>, vector<8x32xf32>
    %c0_1 = arith.constant 0 : index
    %c0_2 = arith.constant 0 : index
    %1 = vector.load %arg2[%c0_1, %c0_2] : memref<32x192xf32, #tpu.memory_space<vmem>>, vector<32x192xf32>
    %cst = arith.constant dense<0.000000e+00> : vector<8x192xf32>
    %2 = tpu.matmul %0, %1, %cst {dimension_numbers = #tpu.dot_dimension_numbers<[1], [0], [0], [1], [0, 0, 1, 1], [], []>} : vector<8x32xf32>, vector<32x192xf32>, vector<8x192xf32> -> vector<8x192xf32>
    %c0_3 = arith.constant 0 : index
    %c0_4 = arith.constant 0 : index
    %3 = vector.load %arg3[%c0_3, %c0_4] : memref<1x192xf32, #tpu.memory_space<vmem>>, vector<1x192xf32>
    %4 = vector.broadcast %3 : vector<1x192xf32> to vector<8x192xf32>
    %5 = arith.addf %2, %4 : vector<8x192xf32>
    %cst_5 = arith.constant 0.000000e+00 : f32
    %6 = vector.broadcast %cst_5 : f32 to vector<8x192xf32>
    %7 = arith.maximumf %5, %6 : vector<8x192xf32>
    %c0_6 = arith.constant 0 : index
    %c0_7 = arith.constant 0 : index
    %8 = vector.load %arg4[%c0_6, %c0_7] : memref<192x144xf32, #tpu.memory_space<vmem>>, vector<192x144xf32>
    %cst_8 = arith.constant dense<0.000000e+00> : vector<8x144xf32>
    %9 = tpu.matmul %7, %8, %cst_8 {dimension_numbers = #tpu.dot_dimension_numbers<[1], [0], [0], [1], [0, 0, 1, 1], [], []>} : vector<8x192xf32>, vector<192x144xf32>, vector<8x144xf32> -> vector<8x144xf32>
    %c0_9 = arith.constant 0 : index
    %c0_10 = arith.constant 0 : index
    %10 = vector.load %arg5[%c0_9, %c0_10] : memref<1x144xf32, #tpu.memory_space<vmem>>, vector<1x144xf32>
    %11 = vector.broadcast %10 : vector<1x144xf32> to vector<8x144xf32>
    %12 = arith.addf %9, %11 : vector<8x144xf32>
    %cst_11 = arith.constant 0.000000e+00 : f32
    %13 = vector.broadcast %cst_11 : f32 to vector<8x144xf32>
    %14 = arith.maximumf %12, %13 : vector<8x144xf32>
    %c0_12 = arith.constant 0 : index
    %c0_13 = arith.constant 0 : index
    %15 = vector.load %arg6[%c0_12, %c0_13] : memref<144x120xf32, #tpu.memory_space<vmem>>, vector<144x120xf32>
    %cst_14 = arith.constant dense<0.000000e+00> : vector<8x120xf32>
    %16 = tpu.matmul %14, %15, %cst_14 {dimension_numbers = #tpu.dot_dimension_numbers<[1], [0], [0], [1], [0, 0, 1, 1], [], []>} : vector<8x144xf32>, vector<144x120xf32>, vector<8x120xf32> -> vector<8x120xf32>
    %c0_15 = arith.constant 0 : index
    %c0_16 = arith.constant 0 : index
    %17 = vector.load %arg7[%c0_15, %c0_16] : memref<1x120xf32, #tpu.memory_space<vmem>>, vector<1x120xf32>
    %18 = vector.broadcast %17 : vector<1x120xf32> to vector<8x120xf32>
    %19 = arith.addf %16, %18 : vector<8x120xf32>
    %cst_17 = arith.constant 0.000000e+00 : f32
    %20 = vector.broadcast %cst_17 : f32 to vector<8x120xf32>
    %21 = arith.maximumf %19, %20 : vector<8x120xf32>
    %c0_18 = arith.constant 0 : index
    %c0_19 = arith.constant 0 : index
    %22 = vector.load %arg8[%c0_18, %c0_19] : memref<120x128xf32, #tpu.memory_space<vmem>>, vector<120x128xf32>
    %cst_20 = arith.constant dense<0.000000e+00> : vector<8x128xf32>
    %23 = tpu.matmul %21, %22, %cst_20 {dimension_numbers = #tpu.dot_dimension_numbers<[1], [0], [0], [1], [0, 0, 1, 1], [], []>} : vector<8x120xf32>, vector<120x128xf32>, vector<8x128xf32> -> vector<8x128xf32>
    %c0_21 = arith.constant 0 : index
    %c0_22 = arith.constant 0 : index
    %24 = vector.load %arg9[%c0_21, %c0_22] : memref<1x128xf32, #tpu.memory_space<vmem>>, vector<1x128xf32>
    %25 = vector.broadcast %24 : vector<1x128xf32> to vector<8x128xf32>
    %26 = arith.addf %23, %25 : vector<8x128xf32>
    %c0_23 = arith.constant 0 : index
    %c0_24 = arith.constant 0 : index
    %27 = vector.load %arg10[%c0_23, %c0_24] : memref<8x128xf32, #tpu.memory_space<vmem>>, vector<8x128xf32>
    tpu.vector_store %arg10[%c0_23, %c0_24], %26 {strides = array<i32>} : memref<8x128xf32, #tpu.memory_space<vmem>>, vector<8x128xf32>,
    return
  }
  func.func @transform_0(%arg0: i32) -> (i32, i32) {
    %c0_i32 = arith.constant 0 : i32
    %c0_i32_0 = arith.constant 0 : i32
    return %arg0, %c0_i32 : i32, i32
  }
  func.func @transform_1(%arg0: i32) -> (i32, i32) {
    %c0_i32 = arith.constant 0 : i32
    %c0_i32_0 = arith.constant 0 : i32
    %c0_i32_1 = arith.constant 0 : i32
    return %c0_i32, %c0_i32_0 : i32, i32
  }
  func.func @transform_2(%arg0: i32) -> (i32, i32) {
    %c0_i32 = arith.constant 0 : i32
    %c0_i32_0 = arith.constant 0 : i32
    %c0_i32_1 = arith.constant 0 : i32
    return %c0_i32, %c0_i32_0 : i32, i32
  }
  func.func @transform_3(%arg0: i32) -> (i32, i32) {
    %c0_i32 = arith.constant 0 : i32
    %c0_i32_0 = arith.constant 0 : i32
    %c0_i32_1 = arith.constant 0 : i32
    return %c0_i32, %c0_i32_0 : i32, i32
  }
  func.func @transform_4(%arg0: i32) -> (i32, i32) {
    %c0_i32 = arith.constant 0 : i32
    %c0_i32_0 = arith.constant 0 : i32
    %c0_i32_1 = arith.constant 0 : i32
    return %c0_i32, %c0_i32_0 : i32, i32
  }
  func.func @transform_5(%arg0: i32) -> (i32, i32) {
    %c0_i32 = arith.constant 0 : i32
    %c0_i32_0 = arith.constant 0 : i32
    %c0_i32_1 = arith.constant 0 : i32
    return %c0_i32, %c0_i32_0 : i32, i32
  }
  func.func @transform_6(%arg0: i32) -> (i32, i32) {
    %c0_i32 = arith.constant 0 : i32
    %c0_i32_0 = arith.constant 0 : i32
    %c0_i32_1 = arith.constant 0 : i32
    return %c0_i32, %c0_i32_0 : i32, i32
  }
  func.func @transform_7(%arg0: i32) -> (i32, i32) {
    %c0_i32 = arith.constant 0 : i32
    %c0_i32_0 = arith.constant 0 : i32
    %c0_i32_1 = arith.constant 0 : i32
    return %c0_i32, %c0_i32_0 : i32, i32
  }
  func.func @transform_8(%arg0: i32) -> (i32, i32) {
    %c0_i32 = arith.constant 0 : i32
    %c0_i32_0 = arith.constant 0 : i32
    %c0_i32_1 = arith.constant 0 : i32
    return %c0_i32, %c0_i32_0 : i32, i32
  }
  func.func @transform_9(%arg0: i32) -> (i32, i32) {
    %c0_i32 = arith.constant 0 : i32
    %c0_i32_0 = arith.constant 0 : i32
    return %arg0, %c0_i32 : i32, i32
  }
}

</mosaic_0001>

<bundles_post_ra>
// kernel: predictor_bs_forward.1
= control target key start
LH: loop header
LB: loop body
LE: loop exit
PB: predicated region body
PF: predicated region fallthrough
CT: control target
= control target key end

     0   :  { %v525_v3 = vmov 0.0   ;;  %vm53_vm0 = vcmask 261120   ;;  %vm190_vm1 = vcmask 523264   ;;  %vm292_vm2 = vcmask 130048   ;;  %s897_s1 = inlined_call_operand.vmem [shape: f32[32,192], index: 1, kind: input, shape index: {}]   ;;  %s898_s0 = inlined_call_operand.vmem [shape: f32[8,32], index: 0, kind: input, shape index: {}]   ;;  %s899_s3 = inlined_call_operand.vmem [shape: f32[192,144], index: 3, kind: input, shape index: {}]   ;;  %s900_s5 = inlined_call_operand.vmem [shape: f32[144,120], index: 5, kind: input, shape index: {}]   ;;  %s901_s2 = inlined_call_operand.vmem [shape: f32[1,192], index: 2, kind: input, shape index: {}]   ;;  %s902_s4 = inlined_call_operand.vmem [shape: f32[1,144], index: 4, kind: input, shape index: {}]   ;;  %s903_s7 = inlined_call_operand.vmem [shape: f32[120,128], index: 7, kind: input, shape index: {}]   ;;  %s904_s6 = inlined_call_operand.vmem [shape: f32[1,120], index: 6, kind: input, shape index: {}]   ;;  %s905_s8 = inlined_call_operand.vmem [shape: f32[1,128], index: 8, kind: input, shape index: {}]   ;;  %s906_s9 = inlined_call_operand.vmem [shape: f32[8,128], index: 9, kind: output, shape index: {}]  }
   0x1   :  { %v40_v0 = vld [vmem:[%s897_s1 + $0x38] sm:$0xff]  ;;  %v39_v1 = vld [vmem:[%s897_s1 + $0x30] sm:$0xff]  ;;  %v38_v2 = vld [vmem:[%s897_s1 + $0x28] sm:$0xff]  ;;  %121 = vmatprep.mubr.f32.mxu1 %v525_v3  ;;  %296 = vmatprep.subr.mxu0 %v525_v3  ;;  %vm526_vm3 = vmmov 0   ;;  %vm389_vm4 = vcmask 982016  }
   0x2   :  { %81 = vmatprep.subr.mxu1 %v40_v0  ;;  %v37_v4 = vld [vmem:[%s897_s1 + $0x20] sm:$0xff]  ;;  %v36_v5 = vld [vmem:[%s897_s1 + $0x18] sm:$0xff]  ;;  %v35_v6 = vld [vmem:[%s897_s1 + $0x10] sm:$0xff] }
   0x3   :  { %82 = vmatpush1.msra.mxu1 %v39_v1  ;;  %v34_v7 = vld [vmem:[%s897_s1 + $0x8] sm:$0xff]  ;;  %v33_v8 = vld [vmem:[%s897_s1] sm:$0xff]  ;;  %v161_v10 = vld [vmem:[%s899_s3 + $0xf8] sm:$0xff] }
   0x4   :  { %83 = vmatprep.subr.mxu1 %v38_v2  ;;  %v32_v9 = vld [vmem:[%s898_s0] sm:$0xff]  ;;  %v160_v11 = vld [vmem:[%s899_s3 + $0xf0] sm:$0xff]  ;;  %v159_v12 = vld [vmem:[%s899_s3 + $0xe8] sm:$0xff] }
   0x5   :  { %84 = vmatpush1.msra.mxu1 %v37_v4  ;;  %v158_v13 = vld [vmem:[%s899_s3 + $0xe0] sm:$0xff]  ;;  %v157_v14 = vld [vmem:[%s899_s3 + $0xd8] sm:$0xff]  ;;  %v156_v15 = vld [vmem:[%s899_s3 + $0xd0] sm:$0xff] }
   0x6   :  { %85 = vmatprep.subr.mxu1 %v36_v5  ;;  %v155_v16 = vld [vmem:[%s899_s3 + $0xc8] sm:$0xff]  ;;  %v154_v17 = vld [vmem:[%s899_s3 + $0xc0] sm:$0xff]  ;;  %v153_v18 = vld [vmem:[%s899_s3 + $0xb8] sm:$0xff] }
   0x7   :  { %86 = vmatpush1.msra.mxu1 %v35_v6  ;;  %v152_v19 = vld [vmem:[%s899_s3 + $0xb0] sm:$0xff]  ;;  %v151_v20 = vld [vmem:[%s899_s3 + $0xa8] sm:$0xff]  ;;  %v150_v21 = vld [vmem:[%s899_s3 + $0xa0] sm:$0xff] }
   0x8   :  { %87 = vmatprep.subr.mxu1 %v34_v7  ;;  %v149_v22 = vld [vmem:[%s899_s3 + $0x98] sm:$0xff]  ;;  %v148_v23 = vld [vmem:[%s899_s3 + $0x90] sm:$0xff]  ;;  %v147_v24 = vld [vmem:[%s899_s3 + $0x88] sm:$0xff] }
   0x9   :  { %88 = vmatpush1.msra.mxu1 %v33_v8  ;;  %v146_v25 = vld [vmem:[%s899_s3 + $0x80] sm:$0xff]  ;;  %v145_v26 = vld [vmem:[%s899_s3 + $0x78] sm:$0xff]  ;;  %v144_v27 = vld [vmem:[%s899_s3 + $0x70] sm:$0xff] }
   0xa   :  { %468 = vmatmul.mubr.msk.f32.vlgmr.msra.gmra.mxu1 %vm53_vm0, %v32_v9  ;;  %194 = vmatprep.subr.mxu1 %v161_v10  ;;  %v143_v28 = vld [vmem:[%s899_s3 + $0x68] sm:$0xff]  ;;  %v142_v29 = vld [vmem:[%s899_s3 + $0x60] sm:$0xff]  ;;  %v141_v30 = vld [vmem:[%s899_s3 + $0x58] sm:$0xff]  ;;  %v43_v9 = vlaneseq }
   0xb   :  { %195 = vmatpush1.msra.mxu1 %v160_v11  ;;  %v140_v31 = vld [vmem:[%s899_s3 + $0x50] sm:$0xff]  ;;  %v139_v32 = vld [vmem:[%s899_s3 + $0x48] sm:$0xff]  ;;  %v138_v33 = vld [vmem:[%s899_s3 + $0x40] sm:$0xff] }
   0xc   :  { %196 = vmatprep.subr.mxu1 %v159_v12  ;;  %v137_v34 = vld [vmem:[%s899_s3 + $0x38] sm:$0xff]  ;;  %v136_v35 = vld [vmem:[%s899_s3 + $0x30] sm:$0xff]  ;;  %v135_v36 = vld [vmem:[%s899_s3 + $0x28] sm:$0xff]  ;;  %v44_v10 = vshrl.u32 %v43_v9, 7 }
   0xd   :  { %197 = vmatpush1.msra.mxu1 %v158_v13  ;;  %v134_v37 = vld [vmem:[%s899_s3 + $0x20] sm:$0xff]  ;;  %v133_v38 = vld [vmem:[%s899_s3 + $0x18] sm:$0xff]  ;;  %v132_v39 = vld [vmem:[%s899_s3 + $0x10] sm:$0xff] }
   0xe   :  { %198 = vmatprep.subr.mxu1 %v157_v14  ;;  %v131_v40 = vld [vmem:[%s899_s3 + $0x8] sm:$0xff]  ;;  %v130_v41 = vld [vmem:[%s899_s3] sm:$0xff]  ;;  %v177_v42 = vld [vmem:[%s899_s3 + $0x178] sm:$0xff]  ;;  %v45_v11 = vsub.s32 0, %v44_v10  ;;  %v49_v13 = vsub.s32 1, %v44_v10 }
   0xf   :  { %199 = vmatpush1.msra.mxu1 %v156_v15  ;;  %v176_v43 = vld [vmem:[%s899_s3 + $0x170] sm:$0xff]  ;;  %v175_v44 = vld [vmem:[%s899_s3 + $0x168] sm:$0xff]  ;;  %v174_v45 = vld [vmem:[%s899_s3 + $0x160] sm:$0xff] }
  0x10   :  { %200 = vmatprep.subr.mxu1 %v155_v16  ;;  %v173_v46 = vld [vmem:[%s899_s3 + $0x158] sm:$0xff]  ;;  %v172_v47 = vld [vmem:[%s899_s3 + $0x150] sm:$0xff]  ;;  %v171_v48 = vld [vmem:[%s899_s3 + $0x148] sm:$0xff] }
  0x11   :  { %201 = vmatpush1.msra.mxu1 %v154_v17  ;;  %v170_v49 = vld [vmem:[%s899_s3 + $0x140] sm:$0xff]  ;;  %v169_v50 = vld [vmem:[%s899_s3 + $0x138] sm:$0xff]  ;;  %v168_v51 = vld [vmem:[%s899_s3 + $0x130] sm:$0xff] }
  0x12   :  { %202 = vmatprep.subr.mxu1 %v153_v18  ;;  %v167_v52 = vld [vmem:[%s899_s3 + $0x128] sm:$0xff]  ;;  %v166_v53 = vld [vmem:[%s899_s3 + $0x120] sm:$0xff]  ;;  %v165_v54 = vld [vmem:[%s899_s3 + $0x118] sm:$0xff] }
  0x13   :  { %203 = vmatpush1.msra.mxu1 %v152_v19  ;;  %v164_v55 = vld [vmem:[%s899_s3 + $0x110] sm:$0xff]  ;;  %v163_v56 = vld [vmem:[%s899_s3 + $0x108] sm:$0xff]  ;;  %v162_v57 = vld [vmem:[%s899_s3 + $0x100] sm:$0xff] }
  0x14   :  { %204 = vmatprep.subr.mxu1 %v151_v20  ;;  %v282_v58 = vld [vmem:[%s900_s5 + $0x78] sm:$0xff]  ;;  %v281_v59 = vld [vmem:[%s900_s5 + $0x70] sm:$0xff]  ;;  %v280_v60 = vld [vmem:[%s900_s5 + $0x68] sm:$0xff] }
  0x15   :  { %205 = vmatpush1.msra.mxu1 %v150_v21  ;;  %297 = vmatpush1.msra.mxu0 %v282_v58  ;;  %v279_v61 = vld [vmem:[%s900_s5 + $0x60] sm:$0xff]  ;;  %v278_v62 = vld [vmem:[%s900_s5 + $0x58] sm:$0xff]  ;;  %v277_v63 = vld [vmem:[%s900_s5 + $0x50] sm:$0xff] }
  0x16   :  { %206 = vmatprep.subr.mxu1 %v149_v22  ;;  %298 = vmatprep.subr.mxu0 %v525_v3  ;;  %v276_v0 = vld [vmem:[%s900_s5 + $0x48] sm:$0xff]  ;;  %v275_v1 = vld [vmem:[%s900_s5 + $0x40] sm:$0xff]  ;;  %v274_v2 = vld [vmem:[%s900_s5 + $0x38] sm:$0xff] }
  0x17   :  { %207 = vmatpush1.msra.mxu1 %v148_v23  ;;  %299 = vmatpush1.msra.mxu0 %v281_v59  ;;  %v273_v4 = vld [vmem:[%s900_s5 + $0x30] sm:$0xff]  ;;  %v272_v5 = vld [vmem:[%s900_s5 + $0x28] sm:$0xff]  ;;  %v271_v6 = vld [vmem:[%s900_s5 + $0x20] sm:$0xff] }
  0x18   :  { %208 = vmatprep.subr.mxu1 %v147_v24  ;;  %300 = vmatprep.subr.mxu0 %v525_v3  ;;  %v270_v7 = vld [vmem:[%s900_s5 + $0x18] sm:$0xff]  ;;  %v269_v8 = vld [vmem:[%s900_s5 + $0x10] sm:$0xff]  ;;  %v41_v12 = vld [vmem:[%s901_s2] sm:$0x3] }
  0x19   :  { %209 = vmatpush1.msra.mxu1 %v146_v25  ;;  %301 = vmatpush1.msra.mxu0 %v280_v60  ;;  %v46_v14 = vrot.slane %v41_v12, %v45_v11  ;;  %v50_v15 = vrot.slane %v41_v12, %v49_v13  ;;  %v268_v22 = vld [vmem:[%s900_s5 + $0x8] sm:$0xff]  ;;  %v267_v23 = vld [vmem:[%s900_s5] sm:$0xff] }
  0x1a   :  { %210 = vmatprep.subr.mxu1 %v145_v26  ;;  %302 = vmatprep.subr.mxu0 %v525_v3  ;;  %v284_v24 = vld [vmem:[%s900_s5 + $0x88] sm:$0xff]  ;;  %v283_v25 = vld [vmem:[%s900_s5 + $0x80] sm:$0xff] }
  0x1b   :  { %211 = vmatpush1.msra.mxu1 %v144_v27  ;;  %303 = vmatpush1.msra.mxu0 %v279_v61  ;;  %v178_v26 = vld [vmem:[%s902_s4] sm:$0x3] }
  0x1c   :  { %212 = vmatprep.subr.mxu1 %v143_v28  ;;  %304 = vmatprep.subr.mxu0 %v525_v3  ;;  %v183_v27 = vrot.slane %v178_v26, %v45_v11  ;;  %v187_v28 = vrot.slane %v178_v26, %v49_v13 }
  0x1d   :  { %213 = vmatpush1.msra.mxu1 %v142_v29  ;;  %305 = vmatpush1.msra.mxu0 %v278_v62 }
  0x1e   :  { %214 = vmatprep.subr.mxu1 %v141_v30  ;;  %306 = vmatprep.subr.mxu0 %v525_v3 }
  0x1f   :  { %215 = vmatpush1.msra.mxu1 %v140_v31  ;;  %307 = vmatpush1.msra.mxu0 %v277_v63 }
  0x20   :  { %216 = vmatprep.subr.mxu1 %v139_v32  ;;  %308 = vmatprep.subr.mxu0 %v525_v3 }
  0x21   :  { %217 = vmatpush1.msra.mxu1 %v138_v33  ;;  %309 = vmatpush1.msra.mxu0 %v276_v0 }
  0x22   :  { %218 = vmatprep.subr.mxu1 %v137_v34  ;;  %310 = vmatprep.subr.mxu0 %v525_v3 }
  0x23   :  { %219 = vmatpush1.msra.mxu1 %v136_v35  ;;  %311 = vmatpush1.msra.mxu0 %v275_v1  ;;  %v381_v35 = vld [vmem:[%s903_s7 + $0x70] sm:$0xff] }
  0x24   :  { %220 = vmatprep.subr.mxu1 %v135_v36  ;;  %312 = vmatprep.subr.mxu0 %v525_v3  ;;  %v380_v36 = vld [vmem:[%s903_s7 + $0x68] sm:$0xff] }
  0x25   :  { %221 = vmatpush1.msra.mxu1 %v134_v37  ;;  %313 = vmatpush1.msra.mxu0 %v274_v2  ;;  %v379_v37 = vld [vmem:[%s903_s7 + $0x60] sm:$0xff] }
  0x26   :  { %222 = vmatprep.subr.mxu1 %v133_v38  ;;  %314 = vmatprep.subr.mxu0 %v525_v3  ;;  %v378_v38 = vld [vmem:[%s903_s7 + $0x58] sm:$0xff] }
  0x27   :  { %223 = vmatpush1.msra.mxu1 %v132_v39  ;;  %315 = vmatpush1.msra.mxu0 %v273_v4  ;;  %v377_v39 = vld [vmem:[%s903_s7 + $0x50] sm:$0xff] }
  0x28   :  { %224 = vmatprep.subr.mxu1 %v131_v40  ;;  %316 = vmatprep.subr.mxu0 %v525_v3  ;;  %v376_v40 = vld [vmem:[%s903_s7 + $0x48] sm:$0xff] }
  0x29   :  { %225 = vmatpush1.msra.mxu1 %v130_v41  ;;  %317 = vmatpush1.msra.mxu0 %v272_v5  ;;  %v375_v41 = vld [vmem:[%s903_s7 + $0x40] sm:$0xff] }
  0x2a   :  { %242 = vmatprep.subr.mxu1 %v177_v42  ;;  %318 = vmatprep.subr.mxu0 %v525_v3  ;;  %v374_v42 = vld [vmem:[%s903_s7 + $0x38] sm:$0xff] }
  0x2b   :  { %243 = vmatpush2.msra.mxu1 %v176_v43  ;;  %319 = vmatpush1.msra.mxu0 %v271_v6  ;;  %v373_v43 = vld [vmem:[%s903_s7 + $0x30] sm:$0xff] }
  0x2c   :  { %244 = vmatprep.subr.mxu1 %v175_v44  ;;  %320 = vmatprep.subr.mxu0 %v525_v3  ;;  %v372_v44 = vld [vmem:[%s903_s7 + $0x28] sm:$0xff] }
  0x2d   :  { %245 = vmatpush2.msra.mxu1 %v174_v45  ;;  %321 = vmatpush1.msra.mxu0 %v270_v7  ;;  %v371_v45 = vld [vmem:[%s903_s7 + $0x20] sm:$0xff] }
  0x2e   :  { %246 = vmatprep.subr.mxu1 %v173_v46  ;;  %322 = vmatprep.subr.mxu0 %v525_v3  ;;  %v370_v46 = vld [vmem:[%s903_s7 + $0x18] sm:$0xff] }
  0x2f   :  { %247 = vmatpush2.msra.mxu1 %v172_v47  ;;  %323 = vmatpush1.msra.mxu0 %v269_v8  ;;  %v369_v47 = vld [vmem:[%s903_s7 + $0x10] sm:$0xff] }
  0x30   :  { %248 = vmatprep.subr.mxu1 %v171_v48  ;;  %324 = vmatprep.subr.mxu0 %v525_v3  ;;  %v368_v48 = vld [vmem:[%s903_s7 + $0x8] sm:$0xff] }
  0x31   :  { %249 = vmatpush2.msra.mxu1 %v170_v49  ;;  %325 = vmatpush1.msra.mxu0 %v268_v22  ;;  %v367_v49 = vld [vmem:[%s903_s7] sm:$0xff] }
  0x32   :  { %250 = vmatprep.subr.mxu1 %v169_v50  ;;  %326 = vmatprep.subr.mxu0 %v525_v3  ;;  %v470_v50 = vld [vmem:[%s904_s6] ss:$0 sm:$0xff] }
  0x33   :  { %251 = vmatpush2.msra.mxu1 %v168_v51  ;;  %327 = vmatpush1.msra.mxu0 %v267_v23 }
  0x34   :  { %252 = vmatprep.subr.mxu1 %v167_v52  ;;  %356 = vmatprep.subr.mxu0 %v525_v3 }
  0x35   :  { %253 = vmatpush2.msra.mxu1 %v166_v53  ;;  %357 = vmatpush2.msra.mxu0 %v284_v24 }
  0x36   :  { %254 = vmatprep.subr.mxu1 %v165_v54  ;;  %358 = vmatprep.subr.mxu0 %v525_v3 }
  0x37   :  { %255 = vmatpush2.msra.mxu1 %v164_v55  ;;  %359 = vmatpush2.msra.mxu0 %v283_v25  ;;  %v472_v55 = vld [vmem:[%s905_s8] ss:$0 sm:$0xff] }
  0x38   :  { %256 = vmatprep.subr.mxu1 %v163_v56  ;;  %490 = vmatprep.subr.mxu0 %v525_v3 }
  0x39   :  { %257 = vmatpush2.msra.mxu1 %v162_v57 }
  0xca   :  { %v123_v16 = vpop.f32.mrf.mxu1 }
  0xcb   :  { %v124_v17 = vadd.f32 %v123_v16, %v46_v14 }
  0xcc   :  { %v125_v18 = vpop.f32.mrf.mxu1 }
  0xcd   :  { %v126_v19 = vadd.f32 %v125_v18, %v50_v15  ;;  %v128_v21 = vmax.f32 %v124_v17, 0.0 }
  0xcf   :  { %v129_v20 = vmax.f32 %v126_v19, 0.0 }
  0xd1   :  { %469 = vmatprep.mubr.msk.f32.mxu1 %vm190_vm1, %v129_v20 }
  0xd2   :  { %259 = vmatmul.mubr.f32.vlgmr.msra.gmra.mxu1 %v128_v21 }
 0x192   :  { %v260_v29 = vpop.f32.mrf.mxu1 }
 0x193   :  { %v261_v30 = vadd.f32 %v260_v29, %v183_v27 }
 0x194   :  { %v262_v31 = vpop.f32.mrf.mxu1 }
 0x195   :  { %v263_v32 = vadd.f32 %v262_v31, %v187_v28  ;;  %v265_v34 = vmax.f32 %v261_v30, 0.0 }
 0x197   :  { %v266_v33 = vmax.f32 %v263_v32, 0.0 }
 0x199   :  { %471 = vmatprep.mubr.msk.f32.mxu0 %vm292_vm2, %v266_v33 }
 0x19a   :  { %361 = vmatmul.mubr.f32.vlgmr.msra.gmra.mxu0 %v265_v34 }
 0x19b   :  { %491 = vmatpush3.msra.mxu0 %v381_v35  ;;  %520 = vmatprep.mubr.msk.f32.mxu0 %vm526_vm3, %v525_v3 }
 0x19c   :  { %492 = vmatprep.subr.mxu0 %v525_v3 }
 0x19d   :  { %493 = vmatpush3.msra.mxu0 %v380_v36 }
 0x19e   :  { %494 = vmatprep.subr.mxu0 %v525_v3 }
 0x19f   :  { %495 = vmatpush3.msra.mxu0 %v379_v37 }
 0x1a0   :  { %496 = vmatprep.subr.mxu0 %v525_v3 }
 0x1a1   :  { %497 = vmatpush3.msra.mxu0 %v378_v38 }
 0x1a2   :  { %498 = vmatprep.subr.mxu0 %v525_v3 }
 0x1a3   :  { %499 = vmatpush3.msra.mxu0 %v377_v39 }
 0x1a4   :  { %500 = vmatprep.subr.mxu0 %v525_v3 }
 0x1a5   :  { %501 = vmatpush3.msra.mxu0 %v376_v40 }
 0x1a6   :  { %502 = vmatprep.subr.mxu0 %v525_v3 }
 0x1a7   :  { %503 = vmatpush3.msra.mxu0 %v375_v41 }
 0x1a8   :  { %504 = vmatprep.subr.mxu0 %v525_v3 }
 0x1a9   :  { %505 = vmatpush3.msra.mxu0 %v374_v42 }
 0x1aa   :  { %506 = vmatprep.subr.mxu0 %v525_v3 }
 0x1ab   :  { %507 = vmatpush3.msra.mxu0 %v373_v43 }
 0x1ac   :  { %508 = vmatprep.subr.mxu0 %v525_v3 }
 0x1ad   :  { %509 = vmatpush3.msra.mxu0 %v372_v44 }
 0x1ae   :  { %510 = vmatprep.subr.mxu0 %v525_v3 }
 0x1af   :  { %511 = vmatpush3.msra.mxu0 %v371_v45 }
 0x1b0   :  { %512 = vmatprep.subr.mxu0 %v525_v3 }
 0x1b1   :  { %513 = vmatpush3.msra.mxu0 %v370_v46 }
 0x1b2   :  { %514 = vmatprep.subr.mxu0 %v525_v3 }
 0x1b3   :  { %515 = vmatpush3.msra.mxu0 %v369_v47 }
 0x1b4   :  { %516 = vmatprep.subr.mxu0 %v525_v3 }
 0x1b5   :  { %517 = vmatpush3.msra.mxu0 %v368_v48 }
 0x1b6   :  { %518 = vmatprep.subr.mxu0 %v525_v3 }
 0x1b7   :  { %519 = vmatpush3.msra.mxu0 %v367_v49 }
 0x25a   :  { %v362_v51 = vpop.f32.mrf.mxu0 }
 0x25b   :  { %v363_v52 = vadd.f32 %v470_v50, %v362_v51 }
 0x25c   :  { %v364_v53 = vpop.f32.mrf.mxu0 }
 0x25d   :  { %v366_v54 = vmax.f32 %v363_v52, 0.0 }
 0x25f   :  { %521 = vmatmul.mubr.msk.f32.vlgmr.msra.gmra.mxu0 %vm389_vm4, %v366_v54 }
 0x31f   :  { %v459_v56 = vpop.f32.mrf.mxu0 }
 0x320   :  { %v460_v57 = vadd.f32 %v472_v55, %v459_v56 }
 0x321   :  { %v522_v58 = vpop.f32.mrf.mxu0 }
 0x322   :  { %463 = vst [vmem:[%s906_s9] sm:$0xff] %v460_v57 }

</bundles_post_ra>
